<compile_context>
chip_gen: v5e
topology: v5e:2x2
jax: 0.10.0
libtpu: 0.0.40
codegen_flags: <defaults>
</compile_context>

<pallas_src>
import functools

import jax
import jax.numpy as jnp
import numpy as np
from jax.experimental import pallas as pl
from jax.experimental.pallas import tpu as pltpu

HID = 128  # hidden width of the q-network (hard-coded in the PyTorch module)


def _round_up(x, m):
    return ((x + m - 1) // m) * m


def _vmem_limit_bytes(tn, d):
    # resident set: feats tile (x2 buffers, bf16) + A tile (x2, f32) + pinned
    # weights (x2) + q_net / logits intermediates, plus slack.
    est = (2 * tn * d * 2
           + 2 * 4 * tn * 4
           + 2 * (d * HID + HID * HID) * 2
           + 8 * tn * HID * 4
           + (1 << 20))
    return int(min(96 << 20, max(24 << 20, 2 * est)))


def _make_kernel(n_valid, tn):
    shift = float(np.sqrt(HID))          # upper bound on |logit| (tanh outputs)
    inv_sqrt = float(1.0 / np.sqrt(HID))

    def kernel(feats_ref, meanf_ref, w1_ref, b1_ref, w2_ref, b2_ref,
               wall_ref, sel_ref, fold_ref, bfcc_ref,
               a_ref, b_ref, l_ref, c_ref, qmax_scr):
        i = pl.program_id(0)
        w1 = w1_ref[...]                 # (D, 128) bf16
        b1 = b1_ref[...]                 # (1, 128) f32
        w2 = w2_ref[...]                 # (128, 128) bf16
        b2 = b2_ref[...]                 # (1, 128) f32

        def q_net(x_bf16):               # Linear -> ReLU -> Linear -> Tanh
            h = jnp.dot(x_bf16, w1, preferred_element_type=jnp.float32) + b1
            h = jnp.maximum(h, 0.0).astype(jnp.bfloat16)
            h = jnp.dot(h, w2, preferred_element_type=jnp.float32) + b2
            return jnp.tanh(h)           # f32

        @pl.when(i == 0)
        def _init():
            # q_max computed once per bag, reused by every tile.
            qmax_scr[...] = q_net(meanf_ref[...]).astype(jnp.bfloat16)
            b_ref[...] = jnp.zeros_like(b_ref)
            l_ref[...] = jnp.zeros_like(l_ref)
            c_ref[...] = jnp.zeros_like(c_ref)

        x = feats_ref[...]                                    # (TN, D) bf16
        q = q_net(x).astype(jnp.bfloat16)                     # (TN, 128) bf16

        # logits^T (C, TN): contract the hidden (lane) axis of both operands.
        s = jax.lax.dot_general(qmax_scr[...], q, (((1,), (1,)), ((), ())),
                                preferred_element_type=jnp.float32) * inv_sqrt

        # |s| <= sqrt(128), so a constant shift keeps exp in (0, 1]; softmax
        # then only needs a global sum (single pass over N, no running max).
        col = jax.lax.broadcasted_iota(jnp.int32, (1, tn), 1) + i * tn
        valid = (col < n_valid).astype(jnp.float32)           # mask padded rows
        e = jnp.exp(s - shift) * valid                        # (C, TN)

        a_ref[...] = e                                        # lane-dense store
        l_ref[...] += jnp.sum(e, axis=1, keepdims=True)       # (C, 1) denominators
        b_ref[...] += jnp.dot(e.astype(jnp.bfloat16), x,      # (C, D) = A_u^T V
                              preferred_element_type=jnp.float32)

        @pl.when(i == pl.num_programs(0) - 1)
        def _finalize():
            inv_l = pl.reciprocal(l_ref[...], approx=True)    # (C, 1)
            bag = b_ref[...] * inv_l                          # normalized B
            b_ref[...] = bag
            # Conv1d(C, C, kernel_size=D): out[o] = bias[o] + sum_{c,d} W[o,c,d]*B[c,d]
            # as two dense matmuls against pre-arranged weights (no per-class loop).
            pc = jnp.dot(bag, wall_ref[...],
                         preferred_element_type=jnp.float32)             # (C, C*O)
            g = jnp.dot(pc * sel_ref[...], fold_ref[...],
                        preferred_element_type=jnp.float32)              # (C, O)
            c_ref[...] = jnp.sum(g, axis=0, keepdims=True) + bfcc_ref[...]  # (1, O)

    return kernel


def bclassifier_forward(feats, c, params):
    """Forward pass of BClassifier; returns (C, A, B) like the PyTorch module."""
    n, d = feats.shape
    _, num_cls = c.shape
    top_k = max(1, int(0.8 * n))   # guard N==1 (plain int(0.8*N)=0 would NaN)

    w1, b1, w2, b2, wfcc, bfcc = params

    # ---- critical-instance mean via rank-mask matmul (no (top_k*C, D) gather) ----
    # TODO(synk): torch.sort has no Pallas equivalent; the rank computation is
    # plain JAX, the (C, N) @ feats reduction is a single XLA matmul.
    ranks = jnp.argsort(jnp.argsort(-c, axis=0), axis=0)            # (N, C)
    sel_top = (ranks < top_k).astype(jnp.float32) / jnp.float32(top_k)
    mean_feat = sel_top.T @ feats                                   # (C, D)

    # ---- tiling over instances ----
    tn = min(512, _round_up(n, 128))     # multiple of 128 (256-friendly for v6e/v7x MXU)
    n_pad = _round_up(n, tn)
    nt = n_pad // tn
    feats_p = jnp.pad(feats, ((0, n_pad - n), (0, 0))).astype(jnp.bfloat16)

    # ---- Conv1d weights pre-arranged for the in-kernel matmul epilogue ----
    # w_all[d, c*O + o] = wfcc[o, c, d];  sel selects the block-diagonal;
    # fold sums the per-class contributions back to O outputs.
    w_all = jnp.transpose(wfcc, (2, 1, 0)).reshape(d, num_cls * num_cls)
    sel_blk = (jnp.arange(num_cls * num_cls)[None, :] // num_cls
               == jnp.arange(num_cls)[:, None]).astype(jnp.float32)  # (C, C*O)
    fold = jnp.tile(jnp.eye(num_cls, dtype=jnp.float32), (num_cls, 1))  # (C*O, O)

    kernel = _make_kernel(n, tn)
    grid_spec = pltpu.PrefetchScalarGridSpec(
        num_scalar_prefetch=0,
        grid=(nt,),
        in_specs=[
            pl.BlockSpec((tn, d), lambda i: (i, 0)),                       # feats tile
            pl.BlockSpec((num_cls, d), lambda i: (0, 0)),                  # mean_feat
            pl.BlockSpec((d, HID), lambda i: (0, 0)),                      # w1
            pl.BlockSpec((1, HID), lambda i: (0, 0)),                      # b1
            pl.BlockSpec((HID, HID), lambda i: (0, 0)),                    # w2
            pl.BlockSpec((1, HID), lambda i: (0, 0)),                      # b2
            pl.BlockSpec((d, num_cls * num_cls), lambda i: (0, 0)),        # w_all
            pl.BlockSpec((num_cls, num_cls * num_cls), lambda i: (0, 0)),  # sel
            pl.BlockSpec((num_cls * num_cls, num_cls), lambda i: (0, 0)),  # fold
            pl.BlockSpec((1, num_cls), lambda i: (0, 0)),                  # bfcc
        ],
        out_specs=[
            pl.BlockSpec((num_cls, tn), lambda i: (0, i)),   # A^T (unnormalized), lane-dense
            pl.BlockSpec((num_cls, d), lambda i: (0, 0)),    # B (accumulator, finalized in-kernel)
            pl.BlockSpec((num_cls, 1), lambda i: (0, 0)),    # softmax denominators l
            pl.BlockSpec((1, num_cls), lambda i: (0, 0)),    # C (logits)
        ],
        scratch_shapes=[pltpu.VMEM((num_cls, HID), jnp.bfloat16)],  # q_max
    )

    a_unn, bag, lsum, c_out = pl.pallas_call(
        kernel,
        out_shape=(
            jax.ShapeDtypeStruct((num_cls, n_pad), jnp.float32),
            jax.ShapeDtypeStruct((num_cls, d), jnp.float32),
            jax.ShapeDtypeStruct((num_cls, 1), jnp.float32),
            jax.ShapeDtypeStruct((1, num_cls), jnp.float32),
        ),
        grid_spec=grid_spec,
        compiler_params=pltpu.CompilerParams(
            dimension_semantics=("arbitrary",),
            vmem_limit_bytes=_vmem_limit_bytes(tn, d),
        ),
    )(feats_p, mean_feat.astype(jnp.bfloat16),
      w1.astype(jnp.bfloat16), b1.reshape(1, HID),
      w2.astype(jnp.bfloat16), b2.reshape(1, HID),
      w_all, sel_blk, fold, bfcc.reshape(1, num_cls))

    # tiny XLA epilogue: softmax normalization of A + transpose to the module's (N, C).
    a_out = (a_unn[:, :n] / lsum).T
    return c_out, a_out, bag


def reference_forward(feats, c, params):
    """Pure-JAX f32 reference mirroring the PyTorch forward."""
    w1, b1, w2, b2, wfcc, bfcc = params

    def q_net(x):
        return jnp.tanh(jnp.maximum(x @ w1 + b1, 0.0) @ w2 + b2)

    n, d = feats.shape
    _, num_cls = c.shape
    top_k = max(1, int(0.8 * n))
    m_indices = jnp.argsort(-c, axis=0)
    top_indices = m_indices[:top_k, :]
    m_feats = feats[top_indices.reshape(-1), :]
    mean_feat = m_feats.reshape(top_k, num_cls, d).mean(axis=0)
    Q = q_net(feats)
    q_max = q_net(mean_feat)
    A = jax.nn.softmax((Q @ q_max.T) / jnp.sqrt(jnp.float32(HID)), axis=0)
    B = A.T @ feats
    Cout = jnp.einsum('ocd,cd->o', wfcc, B) + bfcc
    return Cout[None, :], A, B


def init_params(key, input_size, output_class):
    ks = jax.random.split(key, 6)
    w1 = 0.1 * jax.random.normal(ks[0], (input_size, HID), jnp.float32)
    b1 = 0.1 * jax.random.normal(ks[1], (HID,), jnp.float32)
    w2 = 0.1 * jax.random.normal(ks[2], (HID, HID), jnp.float32)
    b2 = 0.1 * jax.random.normal(ks[3], (HID,), jnp.float32)
    wfcc = 0.1 * jax.random.normal(ks[4], (output_class, output_class, input_size),
                                   jnp.float32)   # Conv1d weight (C_out, C_in, D)
    bfcc = 0.1 * jax.random.normal(ks[5], (output_class,), jnp.float32)
    return (w1, b1, w2, b2, wfcc, bfcc)


if __name__ == "__main__":
    key = jax.random.PRNGKey(0)
    # (N=16: single-tile path)  (N=700: multi-tile accumulation + padding path)
    for (N, INPUT_SIZE, OUTPUT_CLASS) in [(16, 32, 4), (700, 32, 4)]:
        k_feats, k_c, k_params, key = jax.random.split(key, 4)
        feats = jax.random.normal(k_feats, (N, INPUT_SIZE), jnp.float32)
        c = jax.random.normal(k_c, (N, OUTPUT_CLASS), jnp.float32)
        params = init_params(k_params, INPUT_SIZE, OUTPUT_CLASS)

        c_out, a_out, b_out = bclassifier_forward(feats, c, params)
        jax.block_until_ready((c_out, a_out, b_out))

        c_ref, a_ref, b_ref = reference_forward(feats, c, params)
        assert c_out.shape == (1, OUTPUT_CLASS)
        assert a_out.shape == (N, OUTPUT_CLASS)
        assert b_out.shape == (OUTPUT_CLASS, INPUT_SIZE)
        np.testing.assert_allclose(np.asarray(a_out), np.asarray(a_ref), rtol=2e-2, atol=2e-2)
        np.testing.assert_allclose(np.asarray(b_out), np.asarray(b_ref), rtol=2e-2, atol=2e-2)
        np.testing.assert_allclose(np.asarray(c_out), np.asarray(c_ref), rtol=2e-2, atol=2e-2)

    print("KERNEL_OK")
</pallas_src>

<mosaic_0001>
module attributes {stable_mosaic.version = 11 : i64} {
  func.func @kernel(%arg0: i32, %arg1: memref<128x32xbf16, #tpu.memory_space<vmem>>, %arg2: memref<4x32xbf16, #tpu.memory_space<vmem>>, %arg3: memref<32x128xbf16, #tpu.memory_space<vmem>>, %arg4: memref<1x128xf32, #tpu.memory_space<vmem>>, %arg5: memref<128x128xbf16, #tpu.memory_space<vmem>>, %arg6: memref<1x128xf32, #tpu.memory_space<vmem>>, %arg7: memref<32x16xf32, #tpu.memory_space<vmem>>, %arg8: memref<4x16xf32, #tpu.memory_space<vmem>>, %arg9: memref<16x4xf32, #tpu.memory_space<vmem>>, %arg10: memref<1x4xf32, #tpu.memory_space<vmem>>, %arg11: memref<4x128xf32, #tpu.memory_space<vmem>>, %arg12: memref<4x32xf32, #tpu.memory_space<vmem>>, %arg13: memref<4x1xf32, #tpu.memory_space<vmem>>, %arg14: memref<1x4xf32, #tpu.memory_space<vmem>>, %arg15: memref<4x128xbf16, #tpu.memory_space<vmem>>) attributes {dimension_semantics = [#tpu.dimension_semantics<arbitrary>], iteration_bounds = array<i64: 1>, scalar_prefetch = 0 : i64, scratch_operands = 1 : i64, tpu.core_type = #tpu.core_type<tc>, window_params = [{transform_indices = @transform_0, window_bounds = array<i64: 128, 32>}, {pipeline_mode = #tpu.pipeline_mode<synchronous>, transform_indices = @transform_1, window_bounds = array<i64: 4, 32>}, {pipeline_mode = #tpu.pipeline_mode<synchronous>, transform_indices = @transform_2, window_bounds = array<i64: 32, 128>}, {pipeline_mode = #tpu.pipeline_mode<synchronous>, transform_indices = @transform_3, window_bounds = array<i64: 1, 128>}, {pipeline_mode = #tpu.pipeline_mode<synchronous>, transform_indices = @transform_4, window_bounds = array<i64: 128, 128>}, {pipeline_mode = #tpu.pipeline_mode<synchronous>, transform_indices = @transform_5, window_bounds = array<i64: 1, 128>}, {pipeline_mode = #tpu.pipeline_mode<synchronous>, transform_indices = @transform_6, window_bounds = array<i64: 32, 16>}, {pipeline_mode = #tpu.pipeline_mode<synchronous>, transform_indices = @transform_7, window_bounds = array<i64: 4, 16>}, {pipeline_mode = #tpu.pipeline_mode<synchronous>, transform_indices = @transform_8, window_bounds = array<i64: 16, 4>}, {pipeline_mode = #tpu.pipeline_mode<synchronous>, transform_indices = @transform_9, window_bounds = array<i64: 1, 4>}, {transform_indices = @transform_10, window_bounds = array<i64: 4, 128>}, {pipeline_mode = #tpu.pipeline_mode<synchronous>, transform_indices = @transform_11, window_bounds = array<i64: 4, 32>}, {pipeline_mode = #tpu.pipeline_mode<synchronous>, transform_indices = @transform_12, window_bounds = array<i64: 4, 1>}, {pipeline_mode = #tpu.pipeline_mode<synchronous>, transform_indices = @transform_13, window_bounds = array<i64: 1, 4>}]} {
    %c0 = arith.constant 0 : index
    %c0_0 = arith.constant 0 : index
    %0 = vector.load %arg3[%c0, %c0_0] : memref<32x128xbf16, #tpu.memory_space<vmem>>, vector<32x128xbf16>
    %c0_1 = arith.constant 0 : index
    %c0_2 = arith.constant 0 : index
    %1 = vector.load %arg4[%c0_1, %c0_2] : memref<1x128xf32, #tpu.memory_space<vmem>>, vector<1x128xf32>
    %c0_3 = arith.constant 0 : index
    %c0_4 = arith.constant 0 : index
    %2 = vector.load %arg5[%c0_3, %c0_4] : memref<128x128xbf16, #tpu.memory_space<vmem>>, vector<128x128xbf16>
    %c0_5 = arith.constant 0 : index
    %c0_6 = arith.constant 0 : index
    %3 = vector.load %arg6[%c0_5, %c0_6] : memref<1x128xf32, #tpu.memory_space<vmem>>, vector<1x128xf32>
    %c0_i32 = arith.constant 0 : i32
    %4 = arith.cmpi eq, %arg0, %c0_i32 : i32
    %5 = arith.extui %4 : i1 to i32
    %c0_i32_7 = arith.constant 0 : i32
    %6 = arith.cmpi ne, %5, %c0_i32_7 : i32
    scf.if %6 {
      %c0_31 = arith.constant 0 : index
      %c0_32 = arith.constant 0 : index
      %50 = vector.load %arg2[%c0_31, %c0_32] : memref<4x32xbf16, #tpu.memory_space<vmem>>, vector<4x32xbf16>
      %cst_33 = arith.constant dense<0.000000e+00> : vector<4x128xf32>
      %51 = tpu.matmul %50, %0, %cst_33 {dimension_numbers = #tpu.dot_dimension_numbers<[1], [0], [0], [1], [0, 0, 1, 1], [], []>} : vector<4x32xbf16>, vector<32x128xbf16>, vector<4x128xf32> -> vector<4x128xf32>
      %52 = vector.broadcast %1 : vector<1x128xf32> to vector<4x128xf32>
      %53 = arith.addf %51, %52 : vector<4x128xf32>
      %cst_34 = arith.constant 0.000000e+00 : f32
      %54 = vector.broadcast %cst_34 : f32 to vector<4x128xf32>
      %55 = arith.maximumf %53, %54 : vector<4x128xf32>
      %56 = arith.truncf %55 : vector<4x128xf32> to vector<4x128xbf16>
      %cst_35 = arith.constant dense<0.000000e+00> : vector<4x128xf32>
      %57 = tpu.matmul %56, %2, %cst_35 {dimension_numbers = #tpu.dot_dimension_numbers<[1], [0], [0], [1], [0, 0, 1, 1], [], []>} : vector<4x128xbf16>, vector<128x128xbf16>, vector<4x128xf32> -> vector<4x128xf32>
      %58 = vector.broadcast %3 : vector<1x128xf32> to vector<4x128xf32>
      %59 = arith.addf %57, %58 : vector<4x128xf32>
      %60 = math.tanh %59 : vector<4x128xf32>
      %61 = arith.truncf %60 : vector<4x128xf32> to vector<4x128xbf16>
      %c0_36 = arith.constant 0 : index
      %c0_37 = arith.constant 0 : index
      %62 = vector.load %arg15[%c0_36, %c0_37] : memref<4x128xbf16, #tpu.memory_space<vmem>>, vector<4x128xbf16>
      tpu.vector_store %arg15[%c0_36, %c0_37], %61 {strides = array<i32>} : memref<4x128xbf16, #tpu.memory_space<vmem>>, vector<4x128xbf16>,
      %cst_38 = arith.constant 0.000000e+00 : f32
      %63 = vector.broadcast %cst_38 : f32 to vector<4x32xf32>
      %c0_39 = arith.constant 0 : index
      %c0_40 = arith.constant 0 : index
      %64 = vector.load %arg12[%c0_39, %c0_40] : memref<4x32xf32, #tpu.memory_space<vmem>>, vector<4x32xf32>
      tpu.vector_store %arg12[%c0_39, %c0_40], %63 {strides = array<i32>} : memref<4x32xf32, #tpu.memory_space<vmem>>, vector<4x32xf32>,
      %cst_41 = arith.constant 0.000000e+00 : f32
      %65 = vector.broadcast %cst_41 : f32 to vector<4x1xf32>
      %c0_42 = arith.constant 0 : index
      %c0_43 = arith.constant 0 : index
      %66 = vector.load %arg13[%c0_42, %c0_43] : memref<4x1xf32, #tpu.memory_space<vmem>>, vector<4x1xf32>
      tpu.vector_store %arg13[%c0_42, %c0_43], %65 {strides = array<i32>} : memref<4x1xf32, #tpu.memory_space<vmem>>, vector<4x1xf32>,
      %cst_44 = arith.constant 0.000000e+00 : f32
      %67 = vector.broadcast %cst_44 : f32 to vector<1x4xf32>
      %c0_45 = arith.constant 0 : index
      %c0_46 = arith.constant 0 : index
      %68 = vector.load %arg14[%c0_45, %c0_46] : memref<1x4xf32, #tpu.memory_space<vmem>>, vector<1x4xf32>
      tpu.vector_store %arg14[%c0_45, %c0_46], %67 {strides = array<i32>} : memref<1x4xf32, #tpu.memory_space<vmem>>, vector<1x4xf32>,
    } else {
    }
    %c0_8 = arith.constant 0 : index
    %c0_9 = arith.constant 0 : index
    %7 = vector.load %arg1[%c0_8, %c0_9] : memref<128x32xbf16, #tpu.memory_space<vmem>>, vector<128x32xbf16>
    %cst = arith.constant dense<0.000000e+00> : vector<128x128xf32>
    %8 = tpu.matmul %7, %0, %cst {dimension_numbers = #tpu.dot_dimension_numbers<[1], [0], [0], [1], [0, 0, 1, 1], [], []>} : vector<128x32xbf16>, vector<32x128xbf16>, vector<128x128xf32> -> vector<128x128xf32>
    %9 = vector.broadcast %1 : vector<1x128xf32> to vector<128x128xf32>
    %10 = arith.addf %8, %9 : vector<128x128xf32>
    %cst_10 = arith.constant 0.000000e+00 : f32
    %11 = vector.broadcast %cst_10 : f32 to vector<128x128xf32>
    %12 = arith.maximumf %10, %11 : vector<128x128xf32>
    %13 = arith.truncf %12 : vector<128x128xf32> to vector<128x128xbf16>
    %cst_11 = arith.constant dense<0.000000e+00> : vector<128x128xf32>
    %14 = tpu.matmul %13, %2, %cst_11 {dimension_numbers = #tpu.dot_dimension_numbers<[1], [0], [0], [1], [0, 0, 1, 1], [], []>} : vector<128x128xbf16>, vector<128x128xbf16>, vector<128x128xf32> -> vector<128x128xf32>
    %15 = vector.broadcast %3 : vector<1x128xf32> to vector<128x128xf32>
    %16 = arith.addf %14, %15 : vector<128x128xf32>
    %17 = math.tanh %16 : vector<128x128xf32>
    %18 = arith.truncf %17 : vector<128x128xf32> to vector<128x128xbf16>
    %c0_12 = arith.constant 0 : index
    %c0_13 = arith.constant 0 : index
    %19 = vector.load %arg15[%c0_12, %c0_13] : memref<4x128xbf16, #tpu.memory_space<vmem>>, vector<4x128xbf16>
    %cst_14 = arith.constant dense<0.000000e+00> : vector<4x128xf32>
    %20 = tpu.matmul %19, %18, %cst_14 {dimension_numbers = #tpu.dot_dimension_numbers<[1], [1], [0], [0], [0, 0, 1, 0], [], []>} : vector<4x128xbf16>, vector<128x128xbf16>, vector<4x128xf32> -> vector<4x128xf32>
    %cst_15 = arith.constant 0.0883883461 : f32
    %21 = vector.broadcast %cst_15 : f32 to vector<4x128xf32>
    %22 = arith.mulf %20, %21 : vector<4x128xf32>
    %23 = tpu.iota {dimensions = array<i32: 1>} : vector<1x128xi32>
    %c128_i32 = arith.constant 128 : i32
    %24 = arith.muli %arg0, %c128_i32 : i32
    %25 = vector.broadcast %24 : i32 to vector<1x128xi32>
    %26 = arith.addi %23, %25 : vector<1x128xi32>
    %c16_i32 = arith.constant 16 : i32
    %27 = vector.broadcast %c16_i32 : i32 to vector<1x128xi32>
    %28 = arith.cmpi slt, %26, %27 : vector<1x128xi32>
    %29 = arith.extui %28 : vector<1x128xi1> to vector<1x128xi32>
    %30 = arith.sitofp %29 : vector<1x128xi32> to vector<1x128xf32>
    %cst_16 = arith.constant 11.3137083 : f32
    %31 = vector.broadcast %cst_16 : f32 to vector<4x128xf32>
    %32 = arith.subf %22, %31 : vector<4x128xf32>
    %33 = math.exp %32 : vector<4x128xf32>
    %34 = vector.broadcast %30 : vector<1x128xf32> to vector<4x128xf32>
    %35 = arith.mulf %33, %34 : vector<4x128xf32>
    %c0_17 = arith.constant 0 : index
    %c0_18 = arith.constant 0 : index
    %36 = vector.load %arg11[%c0_17, %c0_18] : memref<4x128xf32, #tpu.memory_space<vmem>>, vector<4x128xf32>
    tpu.vector_store %arg11[%c0_17, %c0_18], %35 {strides = array<i32>} : memref<4x128xf32, #tpu.memory_space<vmem>>, vector<4x128xf32>,
    %c0_19 = arith.constant 0 : index
    %c0_20 = arith.constant 0 : index
    %37 = vector.load %arg13[%c0_19, %c0_20] : memref<4x1xf32, #tpu.memory_space<vmem>>, vector<4x1xf32>
    %cst_21 = arith.constant dense<0.000000e+00> : vector<4xf32>
    %38 = vector.multi_reduction <add>, %35, %cst_21 [1] : vector<4x128xf32> to vector<4xf32>
    %39 = vector.shape_cast %38 : vector<4xf32> to vector<4x1xf32>
    %40 = arith.addf %37, %39 : vector<4x1xf32>
    %c0_22 = arith.constant 0 : index
    %c0_23 = arith.constant 0 : index
    %41 = vector.load %arg13[%c0_22, %c0_23] : memref<4x1xf32, #tpu.memory_space<vmem>>, vector<4x1xf32>
    tpu.vector_store %arg13[%c0_22, %c0_23], %40 {strides = array<i32>} : memref<4x1xf32, #tpu.memory_space<vmem>>, vector<4x1xf32>,
    %c0_24 = arith.constant 0 : index
    %c0_25 = arith.constant 0 : index
    %42 = vector.load %arg12[%c0_24, %c0_25] : memref<4x32xf32, #tpu.memory_space<vmem>>, vector<4x32xf32>
    %43 = arith.truncf %35 : vector<4x128xf32> to vector<4x128xbf16>
    %cst_26 = arith.constant dense<0.000000e+00> : vector<4x32xf32>
    %44 = tpu.matmul %43, %7, %cst_26 {dimension_numbers = #tpu.dot_dimension_numbers<[1], [0], [0], [1], [0, 0, 1, 1], [], []>} : vector<4x128xbf16>, vector<128x32xbf16>, vector<4x32xf32> -> vector<4x32xf32>
    %45 = arith.addf %42, %44 : vector<4x32xf32>
    %c0_27 = arith.constant 0 : index
    %c0_28 = arith.constant 0 : index
    %46 = vector.load %arg12[%c0_27, %c0_28] : memref<4x32xf32, #tpu.memory_space<vmem>>, vector<4x32xf32>
    tpu.vector_store %arg12[%c0_27, %c0_28], %45 {strides = array<i32>} : memref<4x32xf32, #tpu.memory_space<vmem>>, vector<4x32xf32>,
    %c0_i32_29 = arith.constant 0 : i32
    %47 = arith.cmpi eq, %arg0, %c0_i32_29 : i32
    %48 = arith.extui %47 : i1 to i32
    %c0_i32_30 = arith.constant 0 : i32
    %49 = arith.cmpi ne, %48, %c0_i32_30 : i32
    scf.if %49 {
      %c0_31 = arith.constant 0 : index
      %c0_32 = arith.constant 0 : index
      %50 = vector.load %arg13[%c0_31, %c0_32] : memref<4x1xf32, #tpu.memory_space<vmem>>, vector<4x1xf32>
      %51 = tpu.reciprocal %50 {approx = true} : vector<4x1xf32> -> vector<4x1xf32>
      %c0_33 = arith.constant 0 : index
      %c0_34 = arith.constant 0 : index
      %52 = vector.load %arg12[%c0_33, %c0_34] : memref<4x32xf32, #tpu.memory_space<vmem>>, vector<4x32xf32>
      %53 = vector.broadcast %51 : vector<4x1xf32> to vector<4x32xf32>
      %54 = arith.mulf %52, %53 : vector<4x32xf32>
      %c0_35 = arith.constant 0 : index
      %c0_36 = arith.constant 0 : index
      %55 = vector.load %arg12[%c0_35, %c0_36] : memref<4x32xf32, #tpu.memory_space<vmem>>, vector<4x32xf32>
      tpu.vector_store %arg12[%c0_35, %c0_36], %54 {strides = array<i32>} : memref<4x32xf32, #tpu.memory_space<vmem>>, vector<4x32xf32>,
      %c0_37 = arith.constant 0 : index
      %c0_38 = arith.constant 0 : index
      %56 = vector.load %arg7[%c0_37, %c0_38] : memref<32x16xf32, #tpu.memory_space<vmem>>, vector<32x16xf32>
      %cst_39 = arith.constant dense<0.000000e+00> : vector<4x16xf32>
      %57 = tpu.matmul %54, %56, %cst_39 {dimension_numbers = #tpu.dot_dimension_numbers<[1], [0], [0], [1], [0, 0, 1, 1], [], []>} : vector<4x32xf32>, vector<32x16xf32>, vector<4x16xf32> -> vector<4x16xf32>
      %c0_40 = arith.constant 0 : index
      %c0_41 = arith.constant 0 : index
      %58 = vector.load %arg8[%c0_40, %c0_41] : memref<4x16xf32, #tpu.memory_space<vmem>>, vector<4x16xf32>
      %59 = arith.mulf %57, %58 : vector<4x16xf32>
      %c0_42 = arith.constant 0 : index
      %c0_43 = arith.constant 0 : index
      %60 = vector.load %arg9[%c0_42, %c0_43] : memref<16x4xf32, #tpu.memory_space<vmem>>, vector<16x4xf32>
      %cst_44 = arith.constant dense<0.000000e+00> : vector<4x4xf32>
      %61 = tpu.matmul %59, %60, %cst_44 {dimension_numbers = #tpu.dot_dimension_numbers<[1], [0], [0], [1], [0, 0, 1, 1], [], []>} : vector<4x16xf32>, vector<16x4xf32>, vector<4x4xf32> -> vector<4x4xf32>
      %cst_45 = arith.constant dense<0.000000e+00> : vector<4xf32>
      %62 = vector.multi_reduction <add>, %61, %cst_45 [0] : vector<4x4xf32> to vector<4xf32>
      %63 = vector.shape_cast %62 : vector<4xf32> to vector<1x4xf32>
      %c0_46 = arith.constant 0 : index
      %c0_47 = arith.constant 0 : index
      %64 = vector.load %arg10[%c0_46, %c0_47] : memref<1x4xf32, #tpu.memory_space<vmem>>, vector<1x4xf32>
      %65 = arith.addf %63, %64 : vector<1x4xf32>
      %c0_48 = arith.constant 0 : index
      %c0_49 = arith.constant 0 : index
      %66 = vector.load %arg14[%c0_48, %c0_49] : memref<1x4xf32, #tpu.memory_space<vmem>>, vector<1x4xf32>
      tpu.vector_store %arg14[%c0_48, %c0_49], %65 {strides = array<i32>} : memref<1x4xf32, #tpu.memory_space<vmem>>, vector<1x4xf32>,
    } else {
    }
    return
  }
  func.func @transform_0(%arg0: i32) -> (i32, i32) {
    %c0_i32 = arith.constant 0 : i32
    %c0_i32_0 = arith.constant 0 : i32
    return %arg0, %c0_i32 : i32, i32
  }
  func.func @transform_1(%arg0: i32) -> (i32, i32) {
    %c0_i32 = arith.constant 0 : i32
    %c0_i32_0 = arith.constant 0 : i32
    %c0_i32_1 = arith.constant 0 : i32
    return %c0_i32, %c0_i32_0 : i32, i32
  }
  func.func @transform_2(%arg0: i32) -> (i32, i32) {
    %c0_i32 = arith.constant 0 : i32
    %c0_i32_0 = arith.constant 0 : i32
    %c0_i32_1 = arith.constant 0 : i32
    return %c0_i32, %c0_i32_0 : i32, i32
  }
  func.func @transform_3(%arg0: i32) -> (i32, i32) {
    %c0_i32 = arith.constant 0 : i32
    %c0_i32_0 = arith.constant 0 : i32
    %c0_i32_1 = arith.constant 0 : i32
    return %c0_i32, %c0_i32_0 : i32, i32
  }
  func.func @transform_4(%arg0: i32) -> (i32, i32) {
    %c0_i32 = arith.constant 0 : i32
    %c0_i32_0 = arith.constant 0 : i32
    %c0_i32_1 = arith.constant 0 : i32
    return %c0_i32, %c0_i32_0 : i32, i32
  }
  func.func @transform_5(%arg0: i32) -> (i32, i32) {
    %c0_i32 = arith.constant 0 : i32
    %c0_i32_0 = arith.constant 0 : i32
    %c0_i32_1 = arith.constant 0 : i32
    return %c0_i32, %c0_i32_0 : i32, i32
  }
  func.func @transform_6(%arg0: i32) -> (i32, i32) {
    %c0_i32 = arith.constant 0 : i32
    %c0_i32_0 = arith.constant 0 : i32
    %c0_i32_1 = arith.constant 0 : i32
    return %c0_i32, %c0_i32_0 : i32, i32
  }
  func.func @transform_7(%arg0: i32) -> (i32, i32) {
    %c0_i32 = arith.constant 0 : i32
    %c0_i32_0 = arith.constant 0 : i32
    %c0_i32_1 = arith.constant 0 : i32
    return %c0_i32, %c0_i32_0 : i32, i32
  }
  func.func @transform_8(%arg0: i32) -> (i32, i32) {
    %c0_i32 = arith.constant 0 : i32
    %c0_i32_0 = arith.constant 0 : i32
    %c0_i32_1 = arith.constant 0 : i32
    return %c0_i32, %c0_i32_0 : i32, i32
  }
  func.func @transform_9(%arg0: i32) -> (i32, i32) {
    %c0_i32 = arith.constant 0 : i32
    %c0_i32_0 = arith.constant 0 : i32
    %c0_i32_1 = arith.constant 0 : i32
    return %c0_i32, %c0_i32_0 : i32, i32
  }
  func.func @transform_10(%arg0: i32) -> (i32, i32) {
    %c0_i32 = arith.constant 0 : i32
    %c0_i32_0 = arith.constant 0 : i32
    return %c0_i32, %arg0 : i32, i32
  }
  func.func @transform_11(%arg0: i32) -> (i32, i32) {
    %c0_i32 = arith.constant 0 : i32
    %c0_i32_0 = arith.constant 0 : i32
    %c0_i32_1 = arith.constant 0 : i32
    return %c0_i32, %c0_i32_0 : i32, i32
  }
  func.func @transform_12(%arg0: i32) -> (i32, i32) {
    %c0_i32 = arith.constant 0 : i32
    %c0_i32_0 = arith.constant 0 : i32
    %c0_i32_1 = arith.constant 0 : i32
    return %c0_i32, %c0_i32_0 : i32, i32
  }
  func.func @transform_13(%arg0: i32) -> (i32, i32) {
    %c0_i32 = arith.constant 0 : i32
    %c0_i32_0 = arith.constant 0 : i32
    %c0_i32_1 = arith.constant 0 : i32
    return %c0_i32, %c0_i32_0 : i32, i32
  }
}

</mosaic_0001>

<bundles_post_ra>
// kernel: tpu_custom_call.1
= control target key start
LH: loop header
LB: loop body
LE: loop exit
PB: predicated region body
PF: predicated region fallthrough
CT: control target
= control target key end

     0   :  { %19 = vsyncpa [#allocation4], 0  ;;  %s1233_s0 = inlined_call_operand.vmem [shape: bf16[128,32], index: 0, kind: input, shape index: {}]   ;;  %s1234_s1 = inlined_call_operand.vmem [shape: bf16[4,32], index: 1, kind: input, shape index: {}]   ;;  %s1235_s2 = inlined_call_operand.vmem [shape: bf16[32,128], index: 2, kind: input, shape index: {}]   ;;  %s1236_s3 = inlined_call_operand.vmem [shape: f32[1,128], index: 3, kind: input, shape index: {}]   ;;  %s1237_s4 = inlined_call_operand.vmem [shape: bf16[128,128], index: 4, kind: input, shape index: {}]   ;;  %s1238_s5 = inlined_call_operand.vmem [shape: f32[1,128], index: 5, kind: input, shape index: {}]   ;;  %s1239_s6 = inlined_call_operand.vmem [shape: f32[32,16], index: 6, kind: input, shape index: {}]   ;;  %s1240_s7 = inlined_call_operand.vmem [shape: f32[4,16], index: 7, kind: input, shape index: {}]   ;;  %s1241_s8 = inlined_call_operand.vmem [shape: f32[16,4], index: 8, kind: input, shape index: {}]   ;;  %s1242_s9 = inlined_call_operand.vmem [shape: f32[1,4], index: 9, kind: input, shape index: {}]   ;;  %s1243_s10 = inlined_call_operand.hbm [shape: f32[4,128], index: 10, kind: output, shape index: {0}]   ;;  %s1244_s11 = inlined_call_operand.hbm [shape: f32[4,32], index: 11, kind: output, shape index: {1}]   ;;  %s1245_s12 = inlined_call_operand.vmem [shape: f32[4,1], index: 12, kind: output, shape index: {2}]   ;;  %s1246_s13 = inlined_call_operand.hbm [shape: f32[1,4], index: 13, kind: output, shape index: {3}]  }
   0x1   :  { %v790_v0 = vld [vmem:[%s1235_s2 + $0x8] sm:$0xff]  ;;  %v788_v2 = vld [vmem:[%s1235_s2] sm:$0xff] }
   0x2   :  { %v789_v1 = vld [vmem:[%s1235_s2 + $0x8] sm:$0xff]  ;;  %94 = vmatpush.bf16.msra.mxu0 %v790_v0  ;;  %v787_v3 = vld [vmem:[%s1235_s2] sm:$0xff] }
   0x3   :  { %278 = vmatpush.bf16.msra.mxu2 %v789_v1 }
   0x4   :  { %20 = vsyncpa [#allocation6], 0  ;;  %v1035_v4 = vld [vmem:[%s1233_s0] sm:$0xff]  ;;  %vm84_vm0 = vcmask 261120   ;;  %v1046_v6 = vld [vmem:[%s1233_s0 + $0x8] sm:$0xff]  ;;  %vm172_vm1 = vcmask 3072  }
   0x5   :  { %v68_v5 = vld [vmem:[%s1234_s1] sm:$0x3]  ;;  %v1053_v7 = vld [vmem:[%s1233_s0 + $0x10] sm:$0xff]  ;;  %v1060_v8 = vld [vmem:[%s1233_s0 + $0x18] sm:$0xff]  ;;  %vm498_vm3 = vcmask 1043456   ;;  %vm170_vm4 = vcmask 257024  }
   0x6   :  { %95 = vmatpush.bf16.msra.mxu0 %v788_v2  ;;  %v806_v9 = vld [vmem:[%s1237_s4 + $0x38] sm:$0xff]  ;;  %v804_v10 = vld [vmem:[%s1237_s4 + $0x30] sm:$0xff]  ;;  %v802_v11 = vld [vmem:[%s1237_s4 + $0x28] sm:$0xff]  ;;  %vm575_vm5 = vcmask 130048   ;;  %s947_s27 = smov [#allocation5]   ;;  %s618_s29 = sshll.u32 %s1243_s10, 4  ;;  %s619_s29 = int_to_ptr.hbm [resolvable:$true] %s618_s29 }
   0x7   :  { %279 = vmatpush.bf16.msra.mxu2 %v787_v3  ;;  %154 = vmatpush.bf16.msra.mxu1 %v806_v9  ;;  %v811_v12 = vld [vmem:[%s1233_s0 + $0x20] sm:$0xff]  ;;  %v798_v14 = vld [vmem:[%s1237_s4 + $0x18] sm:$0xff]  ;;  %v796_v15 = vld [vmem:[%s1237_s4 + $0x10] sm:$0xff]  ;;  %s948_s30 = smov [#allocation3]   ;;  %vm174_vm6 = vcmask 24576   ;;  %vm599_vm7 = vcmask 27648  }
   0x8   :  { %v800_v13 = vld [vmem:[%s1237_s4 + $0x20] sm:$0xff]  ;;  %v794_v16 = vld [vmem:[%s1237_s4 + $0x8] sm:$0xff]  ;;  %v805_v19 = vld [vmem:[%s1237_s4 + $0x38] sm:$0xff]  ;;  %s616_s14 = sshll.u32 %s948_s30, 4  ;;  %s949_s10 = smov [#allocation7]   ;;  %s617_s14 = int_to_ptr.vmem [resolvable:$true] %s616_s14 }
   0x9   :  { %670 = vmatmul.msk.bf16.vlgmr.msra.gmra.mxu0 %vm84_vm0, %v68_v5  ;;  %v812_v17 = vld [vmem:[%s1233_s0 + $0x28] sm:$0xff]  ;;  %v792_v18 = vld [vmem:[%s1237_s4] sm:$0xff]  ;;  %815 = vmatpush.bf16.msra.mxu3 %v805_v19  ;;  %v803_v20 = vld [vmem:[%s1237_s4 + $0x30] sm:$0xff]  ;;  %s640_s15 = sshll.u32 %s949_s10, 4  ;;  %s642_s18 = sshll.u32 %s1246_s13, 4  ;;  %s641_s15 = int_to_ptr.vmem [resolvable:$true] %s640_s15  ;;  %s643_s18 = int_to_ptr.hbm [resolvable:$true] %s642_s18 }
   0xa   :  { %743 = vmatmul.msk.bf16.vlgmr.msra.gmra.mxu2 %vm84_vm0, %v1035_v4  ;;  %v801_v21 = vld [vmem:[%s1237_s4 + $0x28] sm:$0xff]  ;;  %v813_v22 = vld [vmem:[%s1233_s0 + $0x30] sm:$0xff]  ;;  %v799_v23 = vld [vmem:[%s1237_s4 + $0x20] sm:$0xff] }
   0xb   :  { %155 = vmatpush.bf16.msra.mxu1 %v804_v10  ;;  %v797_v24 = vld [vmem:[%s1237_s4 + $0x18] sm:$0xff]  ;;  %v795_v25 = vld [vmem:[%s1237_s4 + $0x10] sm:$0xff]  ;;  %v793_v26 = vld [vmem:[%s1237_s4 + $0x8] sm:$0xff] }
   0xc   :  { %v814_v27 = vld [vmem:[%s1233_s0 + $0x38] sm:$0xff]  ;;  %v791_v28 = vld [vmem:[%s1237_s4] sm:$0xff]  ;;  %s627_s0 = sshll.u32 %s947_s27, 4  ;;  %s629_s4 = sshll.u32 %s1244_s11, 4  ;;  %s628_s0 = int_to_ptr.vmem [resolvable:$true] %s627_s0  ;;  %s630_s4 = int_to_ptr.hbm [resolvable:$true] %s629_s4 }
   0xd   :  { %816 = vmatpush.bf16.msra.mxu3 %v803_v20  ;;  %v1131_v29 = vld [vmem:[%s1236_s3] ss:$0 sm:$0xff] }
   0xf   :  { %156 = vmatpush.bf16.msra.mxu1 %v802_v11 }
  0x11   :  { %817 = vmatpush.bf16.msra.mxu3 %v801_v21 }
  0x13   :  { %157 = vmatpush.bf16.msra.mxu1 %v800_v13 }
  0x15   :  { %818 = vmatpush.bf16.msra.mxu3 %v799_v23 }
  0x17   :  { %158 = vmatpush.bf16.msra.mxu1 %v798_v14 }
  0x19   :  { %819 = vmatpush.bf16.msra.mxu3 %v797_v24 }
  0x1a   :  { %744 = vmatmul.msk.bf16.gmra.mxu2 %vm84_vm0, %v1046_v6 }
  0x1b   :  { %159 = vmatpush.bf16.msra.mxu1 %v796_v15 }
  0x1d   :  { %820 = vmatpush.bf16.msra.mxu3 %v795_v25 }
  0x1f   :  { %160 = vmatpush.bf16.msra.mxu1 %v794_v16 }
  0x21   :  { %821 = vmatpush.bf16.msra.mxu3 %v793_v26 }
  0x23   :  { %161 = vmatpush.bf16.msra.mxu1 %v792_v18 }
  0x25   :  { %822 = vmatpush.bf16.msra.mxu3 %v791_v28 }
  0x27   :  { %396 = vmatpush.bf16.msrb.mxu1 %v805_v19 }
  0x2a   :  { %745 = vmatmul.msk.bf16.gmra.mxu2 %vm84_vm0, %v1053_v7 }
  0x2b   :  { %397 = vmatpush.bf16.msrb.mxu1 %v803_v20 }
  0x2f   :  { %398 = vmatpush.bf16.msrb.mxu1 %v801_v21 }
  0x33   :  { %399 = vmatpush.bf16.msrb.mxu1 %v799_v23 }
  0x37   :  { %400 = vmatpush.bf16.msrb.mxu1 %v797_v24 }
  0x3a   :  { %746 = vmatmul.msk.bf16.gmra.mxu2 %vm84_vm0, %v1060_v8 }
  0x3b   :  { %401 = vmatpush.bf16.msrb.mxu1 %v795_v25 }
  0x3f   :  { %402 = vmatpush.bf16.msrb.mxu1 %v793_v26  ;;  %v1157_v26 = vld [vmem:[%s1238_s5] ss:$0 sm:$0xff] }
  0x43   :  { %403 = vmatpush.bf16.msrb.mxu1 %v791_v28 }
  0x4a   :  { %747 = vmatmul.msk.bf16.gmra.mxu2 %vm84_vm0, %v811_v12 }
  0x5a   :  { %748 = vmatmul.msk.bf16.gmra.mxu2 %vm84_vm0, %v812_v17 }
  0x6a   :  { %749 = vmatmul.msk.bf16.gmra.mxu2 %vm84_vm0, %v813_v22 }
  0x7a   :  { %750 = vmatmul.msk.bf16.gmra.mxu2 %vm84_vm0, %v814_v27 }
  0x86   :  { %v97_v30 = vpop.f32.mrf.mxu0 }
  0x87   :  { %v98_v31 = vadd.f32 %v1131_v29, %v97_v30 }
  0x89   :  { %v101_v32 = vmax.f32 %v98_v31, 0.0 }
  0x8b   :  { %v102_v33 = vpack.c.bf16 %v101_v32, %v101_v32 }
  0x8d   :  { %v281_v34 = vpop.f32.mrf.mxu2  ;;  %162 = vmatmul.bf16.vlgmr.msra.gmra.mxu1 %v102_v33 }
  0x8e   :  { %v99_v35 = vpop.f32.mrf.mxu0  ;;  %515 = vmatpush.bf16.msra.mxu1 %v814_v27  ;;  %v282_v37 = vadd.f32 %v1131_v29, %v281_v34 }
  0x90   :  { %v321_v40 = vmax.f32 %v282_v37, 0.0 }
  0x92   :  { %516 = vmatpush.bf16.msra.mxu1 %v813_v22 }
  0x95   :  { %v283_v36 = vpop.f32.mrf.mxu2 }
  0x96   :  { %v284_v38 = vadd.f32 %v1131_v29, %v283_v36  ;;  %517 = vmatpush.bf16.msra.mxu1 %v812_v17 }
  0x98   :  { %v322_v39 = vmax.f32 %v284_v38, 0.0 }
  0x9a   :  { %518 = vmatpush.bf16.msra.mxu1 %v811_v12  ;;  %v337_v41 = vpack.c.bf16 %v322_v39, %v321_v40 }
  0x9d   :  { %v286_v42 = vpop.f32.mrf.mxu2  ;;  %404 = vmatmul.bf16.vlgmr.msrb.gmra.mxu1 %v337_v41 }
  0x9e   :  { %519 = vmatpush.bf16.msra.mxu1 %v1060_v8  ;;  %v287_v44 = vadd.f32 %v1131_v29, %v286_v42 }
  0xa0   :  { %v323_v47 = vmax.f32 %v287_v44, 0.0 }
  0xa2   :  { %520 = vmatpush.bf16.msra.mxu1 %v1053_v7 }
  0xa5   :  { %v288_v43 = vpop.f32.mrf.mxu2 }
  0xa6   :  { %v289_v45 = vadd.f32 %v1131_v29, %v288_v43  ;;  %521 = vmatpush.bf16.msra.mxu1 %v1046_v6 }
  0xa8   :  { %v324_v46 = vmax.f32 %v289_v45, 0.0 }
  0xaa   :  { %522 = vmatpush.bf16.msra.mxu1 %v1035_v4  ;;  %v338_v48 = vpack.c.bf16 %v324_v46, %v323_v47 }
  0xad   :  { %v291_v49 = vpop.f32.mrf.mxu2  ;;  %409 = vmatmul.bf16.gmra.mxu1 %v338_v48 }
  0xae   :  { %v292_v50 = vadd.f32 %v1131_v29, %v291_v49 }
  0xb0   :  { %v325_v53 = vmax.f32 %v292_v50, 0.0 }
  0xb5   :  { %v293_v51 = vpop.f32.mrf.mxu2 }
  0xb6   :  { %v294_v52 = vadd.f32 %v1131_v29, %v293_v51 }
  0xb8   :  { %v326_v54 = vmax.f32 %v294_v52, 0.0 }
  0xba   :  { %v339_v55 = vpack.c.bf16 %v326_v54, %v325_v53 }
  0xbc   :  { %414 = vmatmul.bf16.vlgmr.msra.gmra.mxu3 %v339_v55 }
  0xbd   :  { %v296_v56 = vpop.f32.mrf.mxu2 }
  0xbe   :  { %v297_v57 = vadd.f32 %v1131_v29, %v296_v56 }
  0xc0   :  { %v327_v60 = vmax.f32 %v297_v57, 0.0 }
  0xc5   :  { %v298_v58 = vpop.f32.mrf.mxu2 }
  0xc6   :  { %v299_v59 = vadd.f32 %v1131_v29, %v298_v58 }
  0xc8   :  { %v328_v61 = vmax.f32 %v299_v59, 0.0 }
  0xca   :  { %v340_v62 = vpack.c.bf16 %v328_v61, %v327_v60 }
  0xcc   :  { %419 = vmatmul.bf16.gmra.mxu3 %v340_v62 }
  0xcd   :  { %v301_v63 = vpop.f32.mrf.mxu2 }
  0xce   :  { %v302_v0 = vadd.f32 %v1131_v29, %v301_v63 }
  0xd0   :  { %v329_v3 = vmax.f32 %v302_v0, 0.0 }
  0xd5   :  { %v303_v1 = vpop.f32.mrf.mxu2 }
  0xd6   :  { %v304_v2 = vadd.f32 %v1131_v29, %v303_v1 }
  0xd8   :  { %v330_v4 = vmax.f32 %v304_v2, 0.0 }
  0xda   :  { %v341_v5 = vpack.c.bf16 %v330_v4, %v329_v3 }
  0xdc   :  { %424 = vmatmul.bf16.gmra.mxu3 %v341_v5 }
  0xdd   :  { %v306_v6 = vpop.f32.mrf.mxu2 }
  0xde   :  { %v307_v7 = vadd.f32 %v1131_v29, %v306_v6 }
  0xe0   :  { %v331_v10 = vmax.f32 %v307_v7, 0.0 }
  0xe5   :  { %v308_v8 = vpop.f32.mrf.mxu2 }
  0xe6   :  { %v309_v9 = vadd.f32 %v1131_v29, %v308_v8 }
  0xe8   :  { %v332_v11 = vmax.f32 %v309_v9, 0.0 }
  0xea   :  { %v342_v12 = vpack.c.bf16 %v332_v11, %v331_v10 }
  0xec   :  { %429 = vmatmul.bf16.gmra.mxu3 %v342_v12 }
  0xed   :  { %v311_v13 = vpop.f32.mrf.mxu2 }
  0xee   :  { %v312_v14 = vadd.f32 %v1131_v29, %v311_v13 }
  0xf0   :  { %v333_v17 = vmax.f32 %v312_v14, 0.0 }
  0xf5   :  { %v313_v15 = vpop.f32.mrf.mxu2 }
  0xf6   :  { %v314_v16 = vadd.f32 %v1131_v29, %v313_v15 }
  0xf8   :  { %v334_v18 = vmax.f32 %v314_v16, 0.0 }
  0xfa   :  { %v343_v19 = vpack.c.bf16 %v334_v18, %v333_v17 }
  0xfc   :  { %434 = vmatmul.bf16.gmra.mxu3 %v343_v19 }
  0xfd   :  { %v316_v20 = vpop.f32.mrf.mxu2 }
  0xfe   :  { %v317_v21 = vadd.f32 %v1131_v29, %v316_v20 }
 0x100   :  { %v335_v24 = vmax.f32 %v317_v21, 0.0 }
 0x105   :  { %v318_v22 = vpop.f32.mrf.mxu2 }
 0x106   :  { %v319_v23 = vadd.f32 %v1131_v29, %v318_v22 }
 0x108   :  { %v336_v25 = vmax.f32 %v319_v23, 0.0 }
 0x10a   :  { %v344_v27 = vpack.c.bf16 %v336_v25, %v335_v24  ;;  %v163_v28 = vpop.f32.mrf.mxu1 }
 0x10b   :  { %v164_v30 = vadd.f32 %v1157_v26, %v163_v28  ;;  %v484_v28 = vlaneseq }
 0x10c   :  { %439 = vmatmul.bf16.gmra.mxu3 %v344_v27  ;;  %v945_v27 = vmov 0.0  }
 0x10d   :  { %831 = vtanh.f32 %v164_v30  ;;  %173 = vst.msk [vmem:[%s1245_s12] sm:$0xf] %vm172_vm1, %v945_v27 }
 0x10e   :  { %171 = vst.msk [vmem:[#allocation5] sm:$0xf] %vm170_vm4, %v945_v27 }
 0x10f   :  { %175 = vst.msk [vmem:[#allocation7] sm:$0x1] %vm174_vm6, %v945_v27 }
 0x112   :  { %v165_v31 = vpop.f32.mrf.mxu1 }
 0x113   :  { %v832_v32 = vpop.eup %831 }
 0x114   :  { %v168_v33 = vpack.c.bf16 %v832_v32, %v832_v32  ;;  %v485_v32 = vand.u32 127, %v484_v28 }
 0x116   :  { %169 = vst [vmem:[#allocation2] sm:$0x3] %v168_v33  ;;  %vm489_vm2 = vcmp.lt.s32.totalorder %v485_v32, 16 }
 0x11a   :  { %v405_v3 = vpop.f32.mrf.mxu1 }
 0x11b   :  { %v406_v19 = vadd.f32 %v1157_v26, %v405_v3 }
 0x11d   :  { %v469_v25 = vld [vmem:[#allocation2] sm:$0x3] }
 0x122   :  { %v407_v9 = vpop.f32.mrf.mxu1 }
 0x123   :  { %v408_v17 = vadd.f32 %v1157_v26, %v407_v9 }
 0x12a   :  { %v410_v13 = vpop.f32.mrf.mxu1 }
 0x12b   :  { %v411_v16 = vadd.f32 %v1157_v26, %v410_v13 }
 0x132   :  { %v412_v14 = vpop.f32.mrf.mxu1 }
 0x133   :  { %v413_v15 = vadd.f32 %v1157_v26, %v412_v14 }
 0x13f   :  { %v415_v34 = vpop.f32.mrf.mxu3 }
 0x140   :  { %v416_v29 = vadd.f32 %v1157_v26, %v415_v34 }
 0x142   :  { %833 = vtanh.f32 %v416_v29  ;;  %v783_v29 = vsel %vm489_vm2, 1.0, %v945_v27 }
 0x147   :  { %v417_v35 = vpop.f32.mrf.mxu3 }
 0x148   :  { %v418_v36 = vadd.f32 %v1157_v26, %v417_v35  ;;  %v834_v37 = vpop.eup %833 }
 0x14a   :  { %835 = vtanh.f32 %v418_v36 }
 0x14f   :  { %v420_v38 = vpop.f32.mrf.mxu3 }
 0x150   :  { %v836_v39 = vpop.eup %835  ;;  %v421_v41 = vadd.f32 %v1157_v26, %v420_v38 }
 0x151   :  { %v463_v40 = vpack.c.bf16 %v836_v39, %v834_v37  ;;  %v946_v39 = vmov 0  }
 0x152   :  { %837 = vtanh.f32 %v421_v41  ;;  %828 = vset.pattern.permute.xlu0 %v946_v39  ;;  %v546_v41 = vld [vmem:[%s1239_s6 + $0x10] sm:$0xff] }
 0x157   :  { %v422_v42 = vpop.f32.mrf.mxu3 }
 0x158   :  { %v423_v43 = vadd.f32 %v1157_v26, %v422_v42  ;;  %v838_v44 = vpop.eup %837  ;;  %v545_v42 = vld [vmem:[%s1239_s6 + $0x8] sm:$0xff] }
 0x15a   :  { %839 = vtanh.f32 %v423_v43  ;;  %v544_v43 = vld [vmem:[%s1239_s6] sm:$0xff] }
 0x15f   :  { %v425_v45 = vpop.f32.mrf.mxu3 }
 0x160   :  { %v840_v46 = vpop.eup %839  ;;  %v426_v48 = vadd.f32 %v1157_v26, %v425_v45 }
 0x161   :  { %v464_v47 = vpack.c.bf16 %v840_v46, %v838_v44  ;;  %v497_v44 = vld [vmem:[%s1245_s12] sm:$0xf] }
 0x162   :  { %841 = vtanh.f32 %v426_v48 }
 0x167   :  { %v427_v49 = vpop.f32.mrf.mxu3 }
 0x168   :  { %v428_v50 = vadd.f32 %v1157_v26, %v427_v49  ;;  %v842_v51 = vpop.eup %841 }
 0x16a   :  { %843 = vtanh.f32 %v428_v50 }
 0x16f   :  { %v430_v52 = vpop.f32.mrf.mxu3 }
 0x170   :  { %v844_v53 = vpop.eup %843  ;;  %v431_v6 = vadd.f32 %v1157_v26, %v430_v52 }
 0x171   :  { %v465_v54 = vpack.c.bf16 %v844_v53, %v842_v51  ;;  %v574_v53 = vld [vmem:[%s1241_s8 + $0x8] sm:$0xff] }
 0x177   :  { %v432_v55 = vpop.f32.mrf.mxu3 }
 0x178   :  { %v433_v4 = vadd.f32 %v1157_v26, %v432_v55 }
 0x17f   :  { %v435_v56 = vpop.f32.mrf.mxu3 }
 0x180   :  { %v436_v63 = vadd.f32 %v1157_v26, %v435_v56 }
 0x187   :  { %v437_v57 = vpop.f32.mrf.mxu3 }
 0x188   :  { %v438_v62 = vadd.f32 %v1157_v26, %v437_v57 }
 0x18f   :  { %v440_v58 = vpop.f32.mrf.mxu3 }
 0x190   :  { %v441_v59 = vadd.f32 %v1157_v26, %v440_v58  ;;  %v571_v58 = vld [vmem:[%s1240_s7] sm:$0xf] }
 0x192   :  { %845 = vtanh.f32 %v441_v59 }
 0x197   :  { %v442_v60 = vpop.f32.mrf.mxu3 }
 0x198   :  { %v443_v61 = vadd.f32 %v1157_v26, %v442_v60  ;;  %v846_v0 = vpop.eup %845 }
 0x19a   :  { %847 = vtanh.f32 %v443_v61 }
 0x19b   :  { %849 = vtanh.f32 %v438_v62 }
 0x19c   :  { %851 = vtanh.f32 %v436_v63 }
 0x19d   :  { %853 = vtanh.f32 %v433_v4  ;;  %v607_v4 = vld [vmem:[%s1242_s9] sm:$0x1] }
 0x19e   :  { %855 = vtanh.f32 %v431_v6 }
 0x19f   :  { %857 = vtanh.f32 %v413_v15 }
 0x1a0   :  { %v848_v1 = vpop.eup %847  ;;  %859 = vtanh.f32 %v411_v16 }
 0x1a1   :  { %v468_v2 = vpack.c.bf16 %v848_v1, %v846_v0  ;;  %v850_v5 = vpop.eup %849  ;;  %861 = vtanh.f32 %v408_v17 }
 0x1a2   :  { %v852_v7 = vpop.eup %851  ;;  %863 = vtanh.f32 %v406_v19 }
 0x1a3   :  { %470 = vmatpush.bf16.xpose.msrb.mxu0 %v468_v2  ;;  %v467_v8 = vpack.c.bf16 %v850_v5, %v852_v7  ;;  %v854_v10 = vpop.eup %853 }
 0x1a4   :  { %v856_v11 = vpop.eup %855 }
 0x1a5   :  { %v466_v12 = vpack.c.bf16 %v854_v10, %v856_v11  ;;  %v858_v18 = vpop.eup %857 }
 0x1a6   :  { %v860_v20 = vpop.eup %859 }
 0x1a7   :  { %v462_v21 = vpack.c.bf16 %v858_v18, %v860_v20  ;;  %v862_v22 = vpop.eup %861 }
 0x1a8   :  { %v864_v23 = vpop.eup %863 }
 0x1a9   :  { %v461_v24 = vpack.c.bf16 %v862_v22, %v864_v23 }
 0x1ab   :  { %471 = vmatpush.bf16.xpose.msrb.mxu0 %v467_v8 }
 0x1b3   :  { %472 = vmatpush.bf16.xpose.msrb.mxu0 %v466_v12 }
 0x1bb   :  { %473 = vmatpush.bf16.xpose.msrb.mxu0 %v465_v54  ;;  %v573_v54 = vld [vmem:[%s1241_s8] sm:$0xff] }
 0x1c3   :  { %474 = vmatpush.bf16.xpose.msrb.mxu0 %v464_v47  ;;  %v505_v47 = vld [vmem:[#allocation5] sm:$0xf] }
 0x1cb   :  { %475 = vmatpush.bf16.xpose.msrb.mxu0 %v463_v40  ;;  %v547_v40 = vld [vmem:[%s1239_s6 + $0x18] sm:$0xff] }
 0x1cc   :  { %563 = vmatpush.msrb.mxu1 %v547_v40 }
 0x1ce   :  { %564 = vmatpush.msrb.mxu1 %v546_v41 }
 0x1d0   :  { %565 = vmatpush.msrb.mxu1 %v545_v42 }
 0x1d2   :  { %566 = vmatpush.msrb.mxu1 %v544_v43 }
 0x1d3   :  { %476 = vmatpush.bf16.xpose.msrb.mxu0 %v462_v21 }
 0x1db   :  { %477 = vmatpush.bf16.xpose.msrb.mxu0 %v461_v24 }
 0x1e2   :  { %478 = vmatmul.bf16.vlgmr.msrb.gmra.mxu0 %v469_v25 }
 0x1e3   :  { %593 = vmatpush.msra.mxu0 %v574_v53 }
 0x1e5   :  { %594 = vmatpush.msra.mxu0 %v573_v54 }
 0x25f   :  { %v479_v26 = vpop.f32.mrf.mxu0 }
 0x260   :  { %v483_v30 = vmul.f32 0.088388346, %v479_v26 }
 0x262   :  { %v784_v31 = vadd.f32 -11.313708, %v483_v30 }
 0x264   :  { %v493_v33 = vmul.f32 1.442695, %v784_v31 }
 0x266   :  { %865 = vpow2.f32 %v493_v33 }
 0x267   :  { %v481_v34 = vpop.f32.mrf.mxu0 }
 0x26c   :  { %v866_v35 = vpop.eup %865 }
 0x26d   :  { %v495_v36 = vmul.f32 %v866_v35, %v783_v29 }
 0x26f   :  { %v499_v37 = vsel %vm498_vm3, %v495_v36, 0.0  ;;  %496 = vst [vmem:[#allocation3] sm:$0xf] %v495_v36  ;;  %v506_v38 = vpack.c.bf16 %v495_v36, %v495_v36 }
 0x270   :  { %500 = vadd.xlane.f32.xlu0 %v499_v37  ;;  %621 = dma.vmem_to_hbm [thread:$0]  %s617_s14, 64, %s619_s29, [#allocation4]  }
 0x271   :  { %523 = vmatmul.bf16.vlgmr.msra.gmra.mxu1 %v506_v38 }
 0x2e3   :  { %v501_v45 = vpop.xlane.xlu0 %500 }
 0x2e4   :  { %v502_v46 = vadd.f32 %v501_v45, %v497_v44 }
 0x2e6   :  { %504 = vst.msk [vmem:[%s1245_s12] sm:$0xf] %vm172_vm1, %v502_v46 }
 0x2ed   :  { %v534_v48 = vld [vmem:[%s1245_s12] sm:$0xf] }
 0x2ee   :  { %v524_v49 = vpop.f32.mrf.mxu1  ;;  %867 = vrcp.f32 %v534_v48 }
 0x2ef   :  { %v528_v50 = vadd.f32 %v524_v49, %v505_v47 }
 0x2f1   :  { %530 = vst.msk [vmem:[#allocation5] sm:$0xf] %vm170_vm4, %v528_v50 }
 0x2f4   :  { %v868_v51 = vpop.eup %867 }
 0x2f5   :  { %539 = vperm.xlu0 %828, %v868_v51  }
 0x2f6   :  { %v526_v52 = vpop.f32.mrf.mxu1 }
 0x2f8   :  { %v536_v55 = vld [vmem:[#allocation5] sm:$0xf] }
 0x367   :  { %v540_v56 = vpop.permute.xlu0 %539 }
 0x368   :  { %v542_v57 = vmul.f32 %v540_v56, %v536_v55 }
 0x36a   :  { %543 = vst.msk [vmem:[#allocation5] sm:$0xf] %vm170_vm4, %v542_v57  ;;  %785 = vmatmul.msk.f32.vlgmr.msrb.gmra.mxu1 %vm84_vm0, %v542_v57 }
 0x36b   :  { %632 = dma.vmem_to_hbm [thread:$0]  %s628_s0, 64, %s630_s4, [#allocation6]  }
 0x3e7   :  { %v568_v59 = vpop.f32.mrf.mxu1 }
 0x3e8   :  { %v572_v60 = vmul.f32 %v571_v58, %v568_v59 }
 0x3ea   :  { %786 = vmatmul.msk.f32.vlgmr.msra.gmra.mxu0 %vm575_vm5, %v572_v60 }
 0x467   :  { %v596_v61 = vpop.f32.mrf.mxu0 }
 0x468   :  { %v600_v62 = vsel %vm599_vm7, %v596_v61, 0.0 }
 0x469   :  { %v601_v63 = vrot.slane %v600_v62, 4 }
 0x46b   :  { %v602_v0 = vadd.f32 %v601_v63, %v600_v62 }
 0x46d   :  { %v603_v1 = vrot.slane %v602_v0, 2 }
 0x46f   :  { %v604_v2 = vadd.f32 %v603_v1, %v602_v0 }
 0x471   :  { %v605_v3 = vrot.slane %v604_v2, 1 }
 0x473   :  { %v606_v5 = vadd.f32 %v605_v3, %v604_v2 }
 0x475   :  { %v608_v6 = vadd.f32 %v607_v4, %v606_v5 }
 0x477   :  { %610 = vst.msk [vmem:[#allocation7] sm:$0x1] %vm174_vm6, %v608_v6 }
 0x478   :  { %645 = dma.vmem_to_hbm [thread:$0]  %s641_s15, 16, %s643_s18, [#allocation6]  }
 0x479   :  { %941 = dma.done.wait [#allocation4], 64  }
 0x47a   :  { %942 = vsyncadd [#allocation4], 4294967232 }
 0x47b   :  { %943 = dma.done.wait [#allocation6], 80  }
 0x47c   :  { %944 = vsyncadd [#allocation6], 4294967216 }
 0x47d   :  { %660 = vsyncpa [#allocation4], 1 }
 0x47e   :  { %661 = vsyncpa [#allocation6], 1 }

</bundles_post_ra>
